<compile_context>
chip_gen: v5e
topology: v5e:2x2
jax: 0.10.0
libtpu: 0.0.40
codegen_flags: <defaults>
</compile_context>

<pallas_src>
import functools

import jax
import jax.numpy as jnp
from jax.experimental import pallas as pl
from jax.experimental.pallas import tpu as pltpu


# ----------------------------------------------------------------------------
# Small helpers
# ----------------------------------------------------------------------------

def _cdiv(a, b):
    return -(-a // b)


def _round_up(x, m):
    return _cdiv(x, m) * m


def _tpu_generation():
    """Best-effort TPU generation from device_kind; None if unknown."""
    try:
        kind = jax.devices()[0].device_kind.lower()
    except Exception:
        return None
    for tag, gen in (("v7", 7), ("v6", 6), ("v5", 5), ("v4", 4), ("v3", 3), ("v2", 2)):
        if tag in kind:
            return gen
    return None


def _min_grid_steps(batch):
    """On v7x keep >= 2 grid steps for large batches so both TCs get work."""
    gen = _tpu_generation()
    if gen is not None and gen >= 7 and batch >= 512:
        return 2
    return 1


def _choose_tiling(batch, block_b, min_steps):
    """Balanced batch tiling: TB multiple of 16, padding <= 15 rows per step."""
    block_b = _round_up(max(int(block_b), 16), 16)      # guard non-multiple-of-16 callers
    n_steps = max(_cdiv(batch, block_b), min_steps)
    tb = _round_up(_cdiv(batch, n_steps), 16)
    return tb, tb * n_steps, n_steps


# ----------------------------------------------------------------------------
# Kernel
# ----------------------------------------------------------------------------

def critic_kernel(lidar_ref, act_ref,
                  wl_ref, bl_ref,
                  w1h_ref, w1a_ref, b1_ref,
                  w2_ref, b2_ref,
                  w3_ref, b3_ref,
                  out_ref, *, hidden_dim, split_fc2):
    bf16 = jnp.bfloat16
    f32 = jnp.float32
    H = hidden_dim
    action_dim = act_ref.shape[1]

    # In-kernel bf16 cast (VPU, lands in slack) -- no wrapper-side cast/extra HBM pass.
    x = lidar_ref[...].astype(bf16)          # (TB, L) bf16
    a = act_ref[...]                         # (TB, A) f32

    # lidar_fc + ReLU (bf16 matmul, f32 accumulate, f32 bias/ReLU).
    h = jnp.dot(x, wl_ref[...], preferred_element_type=f32) + bl_ref[...]
    h = jnp.maximum(h, 0.0)                  # (TB, H) f32

    # Fused fc1 of both heads: cat([h, a]) @ W1 == h @ W1h + a @ W1a.
    # Hidden part on the MXU (N = 2H); the K=2 action part is a VPU
    # broadcast multiply-add (static unroll, action_dim == 2).
    z1 = jnp.dot(h.astype(bf16), w1h_ref[...], preferred_element_type=f32) + b1_ref[...]
    for j in range(action_dim):
        z1 = z1 + a[:, j:j + 1] * w1a_ref[j:j + 1, :]
    z1 = jnp.maximum(z1, 0.0)                # (TB, 2H) f32
    z1b = z1.astype(bf16)

    # fc2 of both heads.
    if split_fc2:
        # v5e (128x128 MXU): two per-head (H,H) dots -- no zero-block passes.
        z2a = jnp.dot(z1b[:, :H], w2_ref[0], preferred_element_type=f32)
        z2b = jnp.dot(z1b[:, H:], w2_ref[1], preferred_element_type=f32)
        z2 = jnp.concatenate([z2a, z2b], axis=-1) + b2_ref[...]
    else:
        # v6e/v7x (256-wide MXU): block-diagonal (2H,2H) -> one full-width push.
        z2 = jnp.dot(z1b, w2_ref[...], preferred_element_type=f32) + b2_ref[...]
    z2 = jnp.maximum(z2, 0.0)                # (TB, 2H) f32

    # fc3 OFF the MXU: VPU multiply + XLU lane reduction per head (N=2 matmul
    # would waste a full MXU push for 2 output lanes).
    prod = z2 * w3_ref[...]                  # (TB, 2H) f32; w3 row = [w3_q1 | w3_q2]
    q1 = jnp.sum(prod[:, :H], axis=-1, keepdims=True)
    q2 = jnp.sum(prod[:, H:], axis=-1, keepdims=True)
    out_ref[...] = jnp.concatenate([q1, q2], axis=-1) + b3_ref[...]   # (TB, 2) f32


# ----------------------------------------------------------------------------
# Wrapper
# ----------------------------------------------------------------------------

@functools.partial(jax.jit, static_argnames=("block_b",))
def critic_forward(lidar_data, action, params, *, block_b=1024):
    """Returns (q1, q2), each (B, 1) f32. `params` is the packed dict from pack_params."""
    B, L = lidar_data.shape
    A = action.shape[1]
    H = params["wl"].shape[1]
    split_fc2 = params["w2"].ndim == 3       # (2,H,H) stacked vs (2H,2H) block-diag

    TB, Bp, n_steps = _choose_tiling(B, block_b, _min_grid_steps(B))

    if Bp != B:
        pad = Bp - B
        lidar_p = jnp.pad(lidar_data, ((0, pad), (0, 0)))
        action_p = jnp.pad(action, ((0, pad), (0, 0)))
    else:
        lidar_p, action_p = lidar_data, action

    args = (
        lidar_p, action_p,
        params["wl"], params["bl"],
        params["w1h"], params["w1a"], params["b1"],
        params["w2"], params["b2"],
        params["w3"], params["b3"],
    )

    def batch_spec(shape):
        return pl.BlockSpec(shape, lambda i: (i, 0))

    def resident_spec(shape):
        nd = len(shape)
        return pl.BlockSpec(shape, lambda i, _nd=nd: (0,) * _nd)

    in_specs = [
        batch_spec((TB, L)),                  # lidar (f32, cast to bf16 in-kernel)
        batch_spec((TB, A)),                  # action (f32)
        resident_spec((L, H)),                # wl (bf16)
        resident_spec((1, H)),                # bl (f32)
        resident_spec((H, 2 * H)),            # w1h (bf16, both heads fused)
        resident_spec((A, 2 * H)),            # w1a (f32, VPU path)
        resident_spec((1, 2 * H)),            # b1
        resident_spec(params["w2"].shape),    # w2 (bf16): (2H,2H) or (2,H,H)
        resident_spec((1, 2 * H)),            # b2
        resident_spec((1, 2 * H)),            # w3 row (f32, VPU/XLU path)
        resident_spec((1, 2)),                # b3
    ]
    out_specs = pl.BlockSpec((TB, 2), lambda i: (i, 0))

    fc2_flops = 2 * Bp * (2 * H * H if split_fc2 else (2 * H) * (2 * H))
    flops = 2 * Bp * (L * H + H * (2 * H)) + fc2_flops + 2 * Bp * (2 * H)
    bytes_accessed = (
        lidar_p.size * lidar_p.dtype.itemsize
        + action_p.size * action_p.dtype.itemsize
        + sum(int(params[k].size) * params[k].dtype.itemsize
              for k in ("wl", "bl", "w1h", "w1a", "b1", "w2", "b2", "w3", "b3"))
        + Bp * 2 * 4
    )
    cost = pl.CostEstimate(flops=int(flops), transcendentals=0,
                           bytes_accessed=int(bytes_accessed))

    kernel = functools.partial(critic_kernel, hidden_dim=H, split_fc2=split_fc2)

    out = pl.pallas_call(
        kernel,
        out_shape=jax.ShapeDtypeStruct((Bp, 2), jnp.float32),
        grid_spec=pltpu.PrefetchScalarGridSpec(
            num_scalar_prefetch=0,
            grid=(n_steps,),
            in_specs=in_specs,
            out_specs=out_specs,
        ),
        compiler_params=pltpu.CompilerParams(
            dimension_semantics=("parallel",)),
        cost_estimate=cost,
    )(*args)

    out = out[:B]
    return out[:, 0:1], out[:, 1:2]


# ----------------------------------------------------------------------------
# Parameter construction / packing
# ----------------------------------------------------------------------------

def init_params(key, lidar_dim, action_dim, hidden_dim):
    """Raw per-layer params in (in_features, out_features) layout (f32),
    mimicking nn.Linear default init (uniform +-1/sqrt(fan_in))."""
    def linear(k, fan_in, fan_out):
        kw, kb = jax.random.split(k)
        bound = 1.0 / jnp.sqrt(fan_in)
        w = jax.random.uniform(kw, (fan_in, fan_out), jnp.float32, -bound, bound)
        b = jax.random.uniform(kb, (1, fan_out), jnp.float32, -bound, bound)
        return w, b

    keys = jax.random.split(key, 7)
    raw = {}
    raw["wl"], raw["bl"] = linear(keys[0], lidar_dim, hidden_dim)
    raw["w1_q1"], raw["b1_q1"] = linear(keys[1], hidden_dim + action_dim, hidden_dim)
    raw["w2_q1"], raw["b2_q1"] = linear(keys[2], hidden_dim, hidden_dim)
    raw["w3_q1"], raw["b3_q1"] = linear(keys[3], hidden_dim, 1)
    raw["w1_q2"], raw["b1_q2"] = linear(keys[4], hidden_dim + action_dim, hidden_dim)
    raw["w2_q2"], raw["b2_q2"] = linear(keys[5], hidden_dim, hidden_dim)
    raw["w3_q2"], raw["b3_q2"] = linear(keys[6], hidden_dim, 1)
    return raw


def pack_params(raw, hidden_dim, fc2_format=None):
    """Fuse/pack both Q-heads. Matmul weights -> bf16; biases, action weights
    and the fc3 row stay f32 (VPU paths).

    fc2_format: "fused" (block-diag (2H,2H), best on 256-wide MXU: v6e/v7x),
                "split" (stacked (2,H,H), best on 128x128 MXU: v5e and older),
                or None to auto-detect from the local TPU generation.
    """
    if fc2_format is None:
        gen = _tpu_generation()
        fc2_format = "split" if (gen is not None and gen <= 5) else "fused"
    assert fc2_format in ("fused", "split")

    H = hidden_dim
    bf16 = jnp.bfloat16
    p = {}
    p["wl"] = raw["wl"].astype(bf16)
    p["bl"] = raw["bl"]

    # fc1: split each (H+A, H) weight into hidden/action parts, concat heads on out dim.
    p["w1h"] = jnp.concatenate([raw["w1_q1"][:H], raw["w1_q2"][:H]], axis=1).astype(bf16)
    p["w1a"] = jnp.concatenate([raw["w1_q1"][H:], raw["w1_q2"][H:]], axis=1)  # f32 (A, 2H)
    p["b1"] = jnp.concatenate([raw["b1_q1"], raw["b1_q2"]], axis=1)

    # fc2: generation-specific packing.
    if fc2_format == "split":
        p["w2"] = jnp.stack([raw["w2_q1"], raw["w2_q2"]], axis=0).astype(bf16)  # (2,H,H)
    else:
        zhh = jnp.zeros((H, H), jnp.float32)
        w2_top = jnp.concatenate([raw["w2_q1"], zhh], axis=1)
        w2_bot = jnp.concatenate([zhh, raw["w2_q2"]], axis=1)
        p["w2"] = jnp.concatenate([w2_top, w2_bot], axis=0).astype(bf16)        # (2H,2H)
    p["b2"] = jnp.concatenate([raw["b2_q1"], raw["b2_q2"]], axis=1)

    # fc3: single f32 row [w3_q1 | w3_q2] for the VPU multiply + lane reduction.
    p["w3"] = jnp.concatenate([raw["w3_q1"].T, raw["w3_q2"].T], axis=1)          # (1, 2H) f32
    p["b3"] = jnp.concatenate([raw["b3_q1"], raw["b3_q2"]], axis=1)              # (1, 2)
    return p


# ----------------------------------------------------------------------------
# References
# ----------------------------------------------------------------------------

def critic_reference_packed(lidar_data, action, p):
    """Pure-JAX reference mirroring the kernel math (bf16 matmuls, f32 acc, f32 fc3)."""
    bf16, f32 = jnp.bfloat16, jnp.float32
    H = p["wl"].shape[1]
    h = jnp.maximum(
        jnp.dot(lidar_data.astype(bf16), p["wl"], preferred_element_type=f32) + p["bl"], 0.0)
    z1 = jnp.dot(h.astype(bf16), p["w1h"], preferred_element_type=f32) + p["b1"]
    for j in range(action.shape[1]):
        z1 = z1 + action[:, j:j + 1] * p["w1a"][j:j + 1, :]
    z1 = jnp.maximum(z1, 0.0)
    z1b = z1.astype(bf16)
    if p["w2"].ndim == 3:
        z2 = jnp.concatenate(
            [jnp.dot(z1b[:, :H], p["w2"][0], preferred_element_type=f32),
             jnp.dot(z1b[:, H:], p["w2"][1], preferred_element_type=f32)], axis=-1) + p["b2"]
    else:
        z2 = jnp.dot(z1b, p["w2"], preferred_element_type=f32) + p["b2"]
    z2 = jnp.maximum(z2, 0.0)
    prod = z2 * p["w3"]
    q1 = jnp.sum(prod[:, :H], axis=-1, keepdims=True) + p["b3"][:, 0:1]
    q2 = jnp.sum(prod[:, H:], axis=-1, keepdims=True) + p["b3"][:, 1:2]
    return q1, q2


def critic_reference_f32(lidar_data, action, raw):
    """Full-precision reference with the original PyTorch module structure."""
    h = jax.nn.relu(lidar_data @ raw["wl"] + raw["bl"])
    xu = jnp.concatenate([h, action], axis=1)

    def head(t):
        z1 = jax.nn.relu(xu @ raw[f"w1_{t}"] + raw[f"b1_{t}"])
        z2 = jax.nn.relu(z1 @ raw[f"w2_{t}"] + raw[f"b2_{t}"])
        return z2 @ raw[f"w3_{t}"] + raw[f"b3_{t}"]

    return head("q1"), head("q2")


if __name__ == "__main__":
    # Small shapes consistent with the module's forward (H kept a multiple of 128
    # so per-head lane slices in the kernel are lane-aligned).
    B, LIDAR_DIM, ACTION_DIM, HIDDEN_DIM = 8, 64, 2, 128

    key = jax.random.PRNGKey(0)
    k_lidar, k_act, k_params = jax.random.split(key, 3)
    lidar_data = jax.random.normal(k_lidar, (B, LIDAR_DIM), jnp.float32)
    action = jax.random.uniform(k_act, (B, ACTION_DIM), jnp.float32, -1.0, 1.0)

    raw = init_params(k_params, LIDAR_DIM, ACTION_DIM, HIDDEN_DIM)
    f1, f2 = critic_reference_f32(lidar_data, action, raw)

    # Exercise both generation-specific fc2 packings (fused for v6e/v7x,
    # split for v5e) regardless of the local chip.
    for fmt in ("fused", "split"):
        packed = pack_params(raw, HIDDEN_DIM, fc2_format=fmt)

        q1, q2 = critic_forward(lidar_data, action, packed)
        q1 = jax.block_until_ready(q1)
        q2 = jax.block_until_ready(q2)
        assert q1.shape == (B, 1) and q2.shape == (B, 1)

        # Tight check against a JAX reference using the same bf16/f32 math.
        r1, r2 = critic_reference_packed(lidar_data, action, packed)
        assert jnp.allclose(q1, r1, atol=1e-3, rtol=1e-3), fmt
        assert jnp.allclose(q2, r2, atol=1e-3, rtol=1e-3), fmt

        # Loose check against the full-f32 PyTorch-semantics reference
        # (differences come only from bf16 weight/activation rounding).
        assert jnp.allclose(q1, f1, atol=7.5e-2, rtol=7.5e-2), fmt
        assert jnp.allclose(q2, f2, atol=7.5e-2, rtol=7.5e-2), fmt

    print("KERNEL_OK")
</pallas_src>

<mosaic_0001>
module attributes {stable_mosaic.version = 11 : i64} {
  func.func @critic_kernel(%arg0: i32, %arg1: memref<16x64xf32, #tpu.memory_space<vmem>>, %arg2: memref<16x2xf32, #tpu.memory_space<vmem>>, %arg3: memref<64x128xbf16, #tpu.memory_space<vmem>>, %arg4: memref<1x128xf32, #tpu.memory_space<vmem>>, %arg5: memref<128x256xbf16, #tpu.memory_space<vmem>>, %arg6: memref<2x256xf32, #tpu.memory_space<vmem>>, %arg7: memref<1x256xf32, #tpu.memory_space<vmem>>, %arg8: memref<256x256xbf16, #tpu.memory_space<vmem>>, %arg9: memref<1x256xf32, #tpu.memory_space<vmem>>, %arg10: memref<1x256xf32, #tpu.memory_space<vmem>>, %arg11: memref<1x2xf32, #tpu.memory_space<vmem>>, %arg12: memref<16x2xf32, #tpu.memory_space<vmem>>) attributes {dimension_semantics = [#tpu.dimension_semantics<parallel>], iteration_bounds = array<i64: 1>, scalar_prefetch = 0 : i64, scratch_operands = 0 : i64, tpu.core_type = #tpu.core_type<tc>, window_params = [{transform_indices = @transform_0, window_bounds = array<i64: 16, 64>}, {transform_indices = @transform_1, window_bounds = array<i64: 16, 2>}, {pipeline_mode = #tpu.pipeline_mode<synchronous>, transform_indices = @transform_2, window_bounds = array<i64: 64, 128>}, {pipeline_mode = #tpu.pipeline_mode<synchronous>, transform_indices = @transform_3, window_bounds = array<i64: 1, 128>}, {pipeline_mode = #tpu.pipeline_mode<synchronous>, transform_indices = @transform_4, window_bounds = array<i64: 128, 256>}, {pipeline_mode = #tpu.pipeline_mode<synchronous>, transform_indices = @transform_5, window_bounds = array<i64: 2, 256>}, {pipeline_mode = #tpu.pipeline_mode<synchronous>, transform_indices = @transform_6, window_bounds = array<i64: 1, 256>}, {pipeline_mode = #tpu.pipeline_mode<synchronous>, transform_indices = @transform_7, window_bounds = array<i64: 256, 256>}, {pipeline_mode = #tpu.pipeline_mode<synchronous>, transform_indices = @transform_8, window_bounds = array<i64: 1, 256>}, {pipeline_mode = #tpu.pipeline_mode<synchronous>, transform_indices = @transform_9, window_bounds = array<i64: 1, 256>}, {pipeline_mode = #tpu.pipeline_mode<synchronous>, transform_indices = @transform_10, window_bounds = array<i64: 1, 2>}, {transform_indices = @transform_11, window_bounds = array<i64: 16, 2>}]} {
    %c0 = arith.constant 0 : index
    %c0_0 = arith.constant 0 : index
    %0 = vector.load %arg1[%c0, %c0_0] : memref<16x64xf32, #tpu.memory_space<vmem>>, vector<16x64xf32>
    %1 = arith.truncf %0 : vector<16x64xf32> to vector<16x64xbf16>
    %c0_1 = arith.constant 0 : index
    %c0_2 = arith.constant 0 : index
    %2 = vector.load %arg2[%c0_1, %c0_2] : memref<16x2xf32, #tpu.memory_space<vmem>>, vector<16x2xf32>
    %c0_3 = arith.constant 0 : index
    %c0_4 = arith.constant 0 : index
    %3 = vector.load %arg3[%c0_3, %c0_4] : memref<64x128xbf16, #tpu.memory_space<vmem>>, vector<64x128xbf16>
    %cst = arith.constant dense<0.000000e+00> : vector<16x128xf32>
    %4 = tpu.matmul %1, %3, %cst {dimension_numbers = #tpu.dot_dimension_numbers<[1], [0], [0], [1], [0, 0, 1, 1], [], []>} : vector<16x64xbf16>, vector<64x128xbf16>, vector<16x128xf32> -> vector<16x128xf32>
    %c0_5 = arith.constant 0 : index
    %c0_6 = arith.constant 0 : index
    %5 = vector.load %arg4[%c0_5, %c0_6] : memref<1x128xf32, #tpu.memory_space<vmem>>, vector<1x128xf32>
    %6 = vector.broadcast %5 : vector<1x128xf32> to vector<16x128xf32>
    %7 = arith.addf %4, %6 : vector<16x128xf32>
    %cst_7 = arith.constant 0.000000e+00 : f32
    %8 = vector.broadcast %cst_7 : f32 to vector<16x128xf32>
    %9 = arith.maximumf %7, %8 : vector<16x128xf32>
    %10 = arith.truncf %9 : vector<16x128xf32> to vector<16x128xbf16>
    %c0_8 = arith.constant 0 : index
    %c0_9 = arith.constant 0 : index
    %11 = vector.load %arg5[%c0_8, %c0_9] : memref<128x256xbf16, #tpu.memory_space<vmem>>, vector<128x256xbf16>
    %cst_10 = arith.constant dense<0.000000e+00> : vector<16x256xf32>
    %12 = tpu.matmul %10, %11, %cst_10 {dimension_numbers = #tpu.dot_dimension_numbers<[1], [0], [0], [1], [0, 0, 1, 1], [], []>} : vector<16x128xbf16>, vector<128x256xbf16>, vector<16x256xf32> -> vector<16x256xf32>
    %c0_11 = arith.constant 0 : index
    %c0_12 = arith.constant 0 : index
    %13 = vector.load %arg7[%c0_11, %c0_12] : memref<1x256xf32, #tpu.memory_space<vmem>>, vector<1x256xf32>
    %14 = vector.broadcast %13 : vector<1x256xf32> to vector<16x256xf32>
    %15 = arith.addf %12, %14 : vector<16x256xf32>
    %16 = vector.extract_strided_slice %2 {offsets = [0, 0], sizes = [16, 1], strides = [1, 1]} : vector<16x2xf32> to vector<16x1xf32>
    %c0_13 = arith.constant 0 : index
    %c0_14 = arith.constant 0 : index
    %17 = vector.load %arg6[%c0_13, %c0_14] : memref<2x256xf32, #tpu.memory_space<vmem>>, vector<1x256xf32>
    %18 = vector.broadcast %16 : vector<16x1xf32> to vector<16x256xf32>
    %19 = vector.broadcast %17 : vector<1x256xf32> to vector<16x256xf32>
    %20 = arith.mulf %18, %19 : vector<16x256xf32>
    %21 = arith.addf %15, %20 : vector<16x256xf32>
    %22 = vector.extract_strided_slice %2 {offsets = [0, 1], sizes = [16, 1], strides = [1, 1]} : vector<16x2xf32> to vector<16x1xf32>
    %c1 = arith.constant 1 : index
    %c0_15 = arith.constant 0 : index
    %23 = vector.load %arg6[%c1, %c0_15] : memref<2x256xf32, #tpu.memory_space<vmem>>, vector<1x256xf32>
    %24 = vector.broadcast %22 : vector<16x1xf32> to vector<16x256xf32>
    %25 = vector.broadcast %23 : vector<1x256xf32> to vector<16x256xf32>
    %26 = arith.mulf %24, %25 : vector<16x256xf32>
    %27 = arith.addf %21, %26 : vector<16x256xf32>
    %cst_16 = arith.constant 0.000000e+00 : f32
    %28 = vector.broadcast %cst_16 : f32 to vector<16x256xf32>
    %29 = arith.maximumf %27, %28 : vector<16x256xf32>
    %30 = arith.truncf %29 : vector<16x256xf32> to vector<16x256xbf16>
    %c0_17 = arith.constant 0 : index
    %c0_18 = arith.constant 0 : index
    %31 = vector.load %arg8[%c0_17, %c0_18] : memref<256x256xbf16, #tpu.memory_space<vmem>>, vector<256x256xbf16>
    %cst_19 = arith.constant dense<0.000000e+00> : vector<16x256xf32>
    %32 = tpu.matmul %30, %31, %cst_19 {dimension_numbers = #tpu.dot_dimension_numbers<[1], [0], [0], [1], [0, 0, 1, 1], [], []>} : vector<16x256xbf16>, vector<256x256xbf16>, vector<16x256xf32> -> vector<16x256xf32>
    %c0_20 = arith.constant 0 : index
    %c0_21 = arith.constant 0 : index
    %33 = vector.load %arg9[%c0_20, %c0_21] : memref<1x256xf32, #tpu.memory_space<vmem>>, vector<1x256xf32>
    %34 = vector.broadcast %33 : vector<1x256xf32> to vector<16x256xf32>
    %35 = arith.addf %32, %34 : vector<16x256xf32>
    %cst_22 = arith.constant 0.000000e+00 : f32
    %36 = vector.broadcast %cst_22 : f32 to vector<16x256xf32>
    %37 = arith.maximumf %35, %36 : vector<16x256xf32>
    %c0_23 = arith.constant 0 : index
    %c0_24 = arith.constant 0 : index
    %38 = vector.load %arg10[%c0_23, %c0_24] : memref<1x256xf32, #tpu.memory_space<vmem>>, vector<1x256xf32>
    %39 = vector.broadcast %38 : vector<1x256xf32> to vector<16x256xf32>
    %40 = arith.mulf %37, %39 : vector<16x256xf32>
    %41 = vector.extract_strided_slice %40 {offsets = [0, 0], sizes = [16, 128], strides = [1, 1]} : vector<16x256xf32> to vector<16x128xf32>
    %cst_25 = arith.constant dense<0.000000e+00> : vector<16xf32>
    %42 = vector.multi_reduction <add>, %41, %cst_25 [1] : vector<16x128xf32> to vector<16xf32>
    %43 = vector.shape_cast %42 : vector<16xf32> to vector<16x1xf32>
    %44 = vector.extract_strided_slice %40 {offsets = [0, 128], sizes = [16, 128], strides = [1, 1]} : vector<16x256xf32> to vector<16x128xf32>
    %cst_26 = arith.constant dense<0.000000e+00> : vector<16xf32>
    %45 = vector.multi_reduction <add>, %44, %cst_26 [1] : vector<16x128xf32> to vector<16xf32>
    %46 = vector.shape_cast %45 : vector<16xf32> to vector<16x1xf32>
    %47 = tpu.concatenate %43, %46 in 1 : vector<16x1xf32>, vector<16x1xf32> -> vector<16x2xf32>
    %c0_27 = arith.constant 0 : index
    %c0_28 = arith.constant 0 : index
    %48 = vector.load %arg11[%c0_27, %c0_28] : memref<1x2xf32, #tpu.memory_space<vmem>>, vector<1x2xf32>
    %49 = vector.broadcast %48 : vector<1x2xf32> to vector<16x2xf32>
    %50 = arith.addf %47, %49 : vector<16x2xf32>
    %c0_29 = arith.constant 0 : index
    %c0_30 = arith.constant 0 : index
    %51 = vector.load %arg12[%c0_29, %c0_30] : memref<16x2xf32, #tpu.memory_space<vmem>>, vector<16x2xf32>
    tpu.vector_store %arg12[%c0_29, %c0_30], %50 {strides = array<i32>} : memref<16x2xf32, #tpu.memory_space<vmem>>, vector<16x2xf32>,
    return
  }
  func.func @transform_0(%arg0: i32) -> (i32, i32) {
    %c0_i32 = arith.constant 0 : i32
    %c0_i32_0 = arith.constant 0 : i32
    return %arg0, %c0_i32 : i32, i32
  }
  func.func @transform_1(%arg0: i32) -> (i32, i32) {
    %c0_i32 = arith.constant 0 : i32
    %c0_i32_0 = arith.constant 0 : i32
    return %arg0, %c0_i32 : i32, i32
  }
  func.func @transform_2(%arg0: i32) -> (i32, i32) {
    %c0_i32 = arith.constant 0 : i32
    %c0_i32_0 = arith.constant 0 : i32
    %c0_i32_1 = arith.constant 0 : i32
    return %c0_i32, %c0_i32_0 : i32, i32
  }
  func.func @transform_3(%arg0: i32) -> (i32, i32) {
    %c0_i32 = arith.constant 0 : i32
    %c0_i32_0 = arith.constant 0 : i32
    %c0_i32_1 = arith.constant 0 : i32
    return %c0_i32, %c0_i32_0 : i32, i32
  }
  func.func @transform_4(%arg0: i32) -> (i32, i32) {
    %c0_i32 = arith.constant 0 : i32
    %c0_i32_0 = arith.constant 0 : i32
    %c0_i32_1 = arith.constant 0 : i32
    return %c0_i32, %c0_i32_0 : i32, i32
  }
  func.func @transform_5(%arg0: i32) -> (i32, i32) {
    %c0_i32 = arith.constant 0 : i32
    %c0_i32_0 = arith.constant 0 : i32
    %c0_i32_1 = arith.constant 0 : i32
    return %c0_i32, %c0_i32_0 : i32, i32
  }
  func.func @transform_6(%arg0: i32) -> (i32, i32) {
    %c0_i32 = arith.constant 0 : i32
    %c0_i32_0 = arith.constant 0 : i32
    %c0_i32_1 = arith.constant 0 : i32
    return %c0_i32, %c0_i32_0 : i32, i32
  }
  func.func @transform_7(%arg0: i32) -> (i32, i32) {
    %c0_i32 = arith.constant 0 : i32
    %c0_i32_0 = arith.constant 0 : i32
    %c0_i32_1 = arith.constant 0 : i32
    return %c0_i32, %c0_i32_0 : i32, i32
  }
  func.func @transform_8(%arg0: i32) -> (i32, i32) {
    %c0_i32 = arith.constant 0 : i32
    %c0_i32_0 = arith.constant 0 : i32
    %c0_i32_1 = arith.constant 0 : i32
    return %c0_i32, %c0_i32_0 : i32, i32
  }
  func.func @transform_9(%arg0: i32) -> (i32, i32) {
    %c0_i32 = arith.constant 0 : i32
    %c0_i32_0 = arith.constant 0 : i32
    %c0_i32_1 = arith.constant 0 : i32
    return %c0_i32, %c0_i32_0 : i32, i32
  }
  func.func @transform_10(%arg0: i32) -> (i32, i32) {
    %c0_i32 = arith.constant 0 : i32
    %c0_i32_0 = arith.constant 0 : i32
    %c0_i32_1 = arith.constant 0 : i32
    return %c0_i32, %c0_i32_0 : i32, i32
  }
  func.func @transform_11(%arg0: i32) -> (i32, i32) {
    %c0_i32 = arith.constant 0 : i32
    %c0_i32_0 = arith.constant 0 : i32
    return %arg0, %c0_i32 : i32, i32
  }
}

</mosaic_0001>

<bundles_post_ra>
// kernel: critic_forward.1
= control target key start
LH: loop header
LB: loop body
LE: loop exit
PB: predicated region body
PF: predicated region fallthrough
CT: control target
= control target key end

     0   :  { %16 = vsyncpa [#allocation3], 0  ;;  %s1058_s0 = inlined_call_operand.vmem [shape: f32[16,64], index: 0, kind: input, shape index: {}]   ;;  %s1059_s1 = inlined_call_operand.vmem [shape: f32[16,2], index: 1, kind: input, shape index: {}]   ;;  %s1060_s2 = inlined_call_operand.vmem [shape: bf16[64,128], index: 2, kind: input, shape index: {}]   ;;  %s1061_s3 = inlined_call_operand.vmem [shape: f32[1,128], index: 3, kind: input, shape index: {}]   ;;  %s1062_s4 = inlined_call_operand.hbm [shape: bf16[128,256], index: 4, kind: input, shape index: {}]   ;;  %s1063_s5 = inlined_call_operand.vmem [shape: f32[2,256], index: 5, kind: input, shape index: {}]   ;;  %s1064_s6 = inlined_call_operand.vmem [shape: f32[1,256], index: 6, kind: input, shape index: {}]   ;;  %s1065_s7 = inlined_call_operand.hbm [shape: bf16[256,256], index: 7, kind: input, shape index: {}]   ;;  %s1066_s8 = inlined_call_operand.vmem [shape: f32[1,256], index: 8, kind: input, shape index: {}]   ;;  %s1067_s9 = inlined_call_operand.vmem [shape: f32[1,256], index: 9, kind: input, shape index: {}]   ;;  %s1068_s10 = inlined_call_operand.vmem [shape: f32[1,2], index: 10, kind: input, shape index: {}]   ;;  %s1069_s11 = inlined_call_operand.vmem [shape: f32[16,2], index: 11, kind: output, shape index: {}]  }
   0x1   :  { %s30_s19 = sshll.u32 %s1062_s4, 4  ;;  %s31_s19 = int_to_ptr.hbm [resolvable:$true] %s30_s19 }
   0x2   :  { %17 = vsyncpa [#allocation5], 0  ;;  %s935_s20 = smov [#allocation2]   ;;  %s47_s24 = sshll.u32 %s1065_s7, 4  ;;  %s48_s24 = int_to_ptr.hbm [resolvable:$true] %s47_s24 }
   0x3   :  { %s32_s21 = sshll.u32 %s935_s20, 4  ;;  %s936_s25 = smov 128   ;;  %s33_s21 = int_to_ptr.vmem [resolvable:$true] %s32_s21 }
   0x4   :  { %s937_s26 = smov 8   ;;  %s938_s27 = smov [#allocation4]  }
   0x5   :  { %38 = dma.hbm_to_vmem [thread:$0]  %s31_s19, 2048, %s33_s21, [#allocation3], %s936_s25, %s936_s25, %s937_s26  }
   0x6   :  { %s49_s28 = sshll.u32 %s938_s27, 4  ;;  %s50_s28 = int_to_ptr.vmem [resolvable:$true] %s49_s28 }
   0x7   :  { %55 = dma.hbm_to_vmem [thread:$0]  %s48_s24, 4096, %s50_s28, [#allocation5], %s936_s25, %s936_s25, %s937_s26  }
   0x8   :  { %931 = dma.done.wait [#allocation3], 2048  }
   0x9   :  { %932 = vsyncadd [#allocation3], 4294965248 }
   0xa   :  { %933 = dma.done.wait [#allocation5], 4096  }
   0xb   :  { %934 = vsyncadd [#allocation5], 4294963200  ;;  %v823_v0 = vld [vmem:[%s1060_s2 + $0x18] sm:$0xff]  ;;  %v822_v1 = vld [vmem:[%s1060_s2 + $0x10] sm:$0xff]  ;;  %vm112_vm0 = vcmask 523264   ;;  %v939_v57 = vmov 0  }
   0xc   :  { %120 = vmatpush.bf16.msra.mxu0 %v823_v0  ;;  %v685_v2 = vld [vmem:[#allocation2 + $0x70] sm:$0xf]  ;;  %v839_v3 = vld [vmem:[#allocation2 + $0x74] sm:$0xf0]  ;;  %v838_v4 = vld [vmem:[#allocation2 + $0x74] sm:$0xf]  ;;  %878 = vset.pattern.permute.xlu0 %v939_v57 }
   0xd   :  { %v686_v5 = vor.u32 %v839_v3, %v685_v2  ;;  %v687_v6 = vld [vmem:[#allocation2 + $0x78] sm:$0xf0]  ;;  %v677_v7 = vld [vmem:[#allocation2 + $0x60] sm:$0xf]  ;;  %v837_v8 = vld [vmem:[#allocation2 + $0x64] sm:$0xf0] }
   0xe   :  { %v690_v9 = vor.u32 %v838_v4, %v687_v6  ;;  %v836_v10 = vld [vmem:[#allocation2 + $0x64] sm:$0xf]  ;;  %v679_v11 = vld [vmem:[#allocation2 + $0x68] sm:$0xf0]  ;;  %v678_v12 = vor.u32 %v837_v8, %v677_v7  ;;  %v669_v15 = vld [vmem:[#allocation2 + $0x50] sm:$0xf] }
   0xf   :  { %235 = vmatpush.bf16.msra.mxu1 %v686_v5  ;;  %v821_v13 = vld [vmem:[%s1060_s2 + $0x8] sm:$0xff]  ;;  %v682_v14 = vor.u32 %v836_v10, %v679_v11  ;;  %v835_v16 = vld [vmem:[#allocation2 + $0x54] sm:$0xf0]  ;;  %v834_v17 = vld [vmem:[#allocation2 + $0x54] sm:$0xf]  ;;  %v940_v58 = vmov 1  }
  0x10   :  { %121 = vmatpush.bf16.msra.mxu0 %v822_v1  ;;  %249 = vmatpush.bf16.msra.mxu2 %v690_v9  ;;  %v671_v18 = vld [vmem:[#allocation2 + $0x58] sm:$0xf0]  ;;  %v820_v19 = vld [vmem:[%s1060_s2] sm:$0xff]  ;;  %v670_v21 = vor.u32 %v835_v16, %v669_v15  ;;  %v72_v22 = vld [vmem:[%s1058_s0 + $0x8] sm:$0xff]  ;;  %vm592_vm1 = vcmask 7168   ;;  %vm601_vm2 = vcmask 15360  }
  0x11   :  { %v71_v20 = vld [vmem:[%s1058_s0] sm:$0xff]  ;;  %v674_v23 = vor.u32 %v834_v17, %v671_v18  ;;  %v833_v25 = vld [vmem:[#allocation2 + $0x44] sm:$0xf0]  ;;  %v663_v27 = vld [vmem:[#allocation2 + $0x48] sm:$0xf0]  ;;  %879 = vset.pattern.permute.xlu1 %v940_v58 }
  0x12   :  { %v661_v24 = vld [vmem:[#allocation2 + $0x40] sm:$0xf]  ;;  %v832_v26 = vld [vmem:[#allocation2 + $0x44] sm:$0xf]  ;;  %v73_v28 = vpack.c.bf16 %v72_v22, %v71_v20  ;;  %v653_v31 = vld [vmem:[#allocation2 + $0x30] sm:$0xf] }
  0x13   :  { %236 = vmatpush.bf16.msra.mxu1 %v678_v12  ;;  %v662_v29 = vor.u32 %v833_v25, %v661_v24  ;;  %v666_v30 = vor.u32 %v832_v26, %v663_v27  ;;  %v831_v32 = vld [vmem:[#allocation2 + $0x34] sm:$0xf0]  ;;  %v830_v33 = vld [vmem:[#allocation2 + $0x34] sm:$0xf]  ;;  %v655_v35 = vld [vmem:[#allocation2 + $0x38] sm:$0xf0] }
  0x14   :  { %122 = vmatpush.bf16.msra.mxu0 %v821_v13  ;;  %250 = vmatpush.bf16.msra.mxu2 %v682_v14  ;;  %v654_v34 = vor.u32 %v831_v32, %v653_v31  ;;  %v658_v36 = vor.u32 %v830_v33, %v655_v35  ;;  %v645_v37 = vld [vmem:[#allocation2 + $0x20] sm:$0xf]  ;;  %v829_v38 = vld [vmem:[#allocation2 + $0x24] sm:$0xf0]  ;;  %v828_v39 = vld [vmem:[#allocation2 + $0x24] sm:$0xf] }
  0x15   :  { %v646_v40 = vor.u32 %v829_v38, %v645_v37  ;;  %v647_v41 = vld [vmem:[#allocation2 + $0x28] sm:$0xf0]  ;;  %v637_v43 = vld [vmem:[#allocation2 + $0x10] sm:$0xf]  ;;  %v827_v44 = vld [vmem:[#allocation2 + $0x14] sm:$0xf0] }
  0x16   :  { %v650_v42 = vor.u32 %v828_v39, %v647_v41  ;;  %v826_v45 = vld [vmem:[#allocation2 + $0x14] sm:$0xf]  ;;  %v638_v46 = vor.u32 %v827_v44, %v637_v43  ;;  %v639_v47 = vld [vmem:[#allocation2 + $0x18] sm:$0xf0]  ;;  %v629_v49 = vld [vmem:[#allocation2] sm:$0xf] }
  0x17   :  { %237 = vmatpush.bf16.msra.mxu1 %v670_v21  ;;  %v642_v48 = vor.u32 %v826_v45, %v639_v47  ;;  %v825_v50 = vld [vmem:[#allocation2 + $0x4] sm:$0xf0]  ;;  %v824_v51 = vld [vmem:[#allocation2 + $0x4] sm:$0xf]  ;;  %v631_v53 = vld [vmem:[#allocation2 + $0x8] sm:$0xf0] }
  0x18   :  { %123 = vmatpush.bf16.msra.mxu0 %v820_v19  ;;  %251 = vmatpush.bf16.msra.mxu2 %v674_v23  ;;  %v630_v52 = vor.u32 %v825_v50, %v629_v49  ;;  %v634_v54 = vor.u32 %v824_v51, %v631_v53  ;;  %v74_v55 = vld [vmem:[%s1059_s1] sm:$0xff]  ;;  %v750_v56 = vld [vmem:[#allocation4 + $0x70] sm:$0xf]  ;;  %v855_v59 = vld [vmem:[#allocation4 + $0x74] sm:$0xf0] }
  0x19   :  { %v854_v60 = vld [vmem:[#allocation4 + $0x74] sm:$0xf]  ;;  %v752_v61 = vld [vmem:[#allocation4 + $0x78] sm:$0xf0]  ;;  %266 = vperm.xlu0 %878, %v74_v55   ;;  %290 = vperm.xlu1 %879, %v74_v55   ;;  %v751_v62 = vor.u32 %v855_v59, %v750_v56  ;;  %v742_v0 = vld [vmem:[#allocation4 + $0x60] sm:$0xf] }
  0x1a   :  { %v755_v63 = vor.u32 %v854_v60, %v752_v61  ;;  %v853_v1 = vld [vmem:[#allocation4 + $0x64] sm:$0xf0]  ;;  %v852_v2 = vld [vmem:[#allocation4 + $0x64] sm:$0xf]  ;;  %v744_v3 = vld [vmem:[#allocation4 + $0x68] sm:$0xf0] }
  0x1b   :  { %626 = vmatmul.msk.bf16.vlgmr.msra.gmra.mxu0 %vm112_vm0, %v73_v28  ;;  %238 = vmatpush.bf16.msra.mxu1 %v662_v29  ;;  %v814_v4 = vld [vmem:[#allocation4 + $0xf0] sm:$0xf]  ;;  %v871_v5 = vld [vmem:[#allocation4 + $0xf4] sm:$0xf0]  ;;  %v743_v6 = vor.u32 %v853_v1, %v742_v0  ;;  %v747_v7 = vor.u32 %v852_v2, %v744_v3  ;;  %v870_v9 = vld [vmem:[#allocation4 + $0xf4] sm:$0xf] }
  0x1c   :  { %252 = vmatpush.bf16.msra.mxu2 %v666_v30  ;;  %514 = vmatpush.bf16.msra.mxu3 %v751_v62  ;;  %v815_v8 = vor.u32 %v871_v5, %v814_v4  ;;  %v816_v10 = vld [vmem:[#allocation4 + $0xf8] sm:$0xf0]  ;;  %v734_v11 = vld [vmem:[#allocation4 + $0x50] sm:$0xf]  ;;  %v851_v13 = vld [vmem:[#allocation4 + $0x54] sm:$0xf0] }
  0x1d   :  { %v819_v12 = vor.u32 %v870_v9, %v816_v10  ;;  %v850_v14 = vld [vmem:[#allocation4 + $0x54] sm:$0xf]  ;;  %v736_v15 = vld [vmem:[#allocation4 + $0x58] sm:$0xf0]  ;;  %v75_v16 = vld [vmem:[%s1059_s1 + $0x8] sm:$0xff]  ;;  %v735_v17 = vor.u32 %v851_v13, %v734_v11 }
  0x1e   :  { %528 = vmatpush.bf16.msrb.mxu0 %v815_v8  ;;  %v739_v18 = vor.u32 %v850_v14, %v736_v15  ;;  %v881_v20 = vld [vmem:[%s1061_s3] ss:$0 sm:$0xff]  ;;  %v869_v28 = vld [vmem:[#allocation4 + $0xe4] sm:$0xf0]  ;;  %v868_v29 = vld [vmem:[#allocation4 + $0xe4] sm:$0xf] }
  0x1f   :  { %239 = vmatpush.bf16.msra.mxu1 %v654_v34  ;;  %v806_v27 = vld [vmem:[#allocation4 + $0xe0] sm:$0xf]  ;;  %v808_v31 = vld [vmem:[#allocation4 + $0xe8] sm:$0xf0]  ;;  %v849_v34 = vld [vmem:[#allocation4 + $0x44] sm:$0xf0] }
  0x20   :  { %253 = vmatpush.bf16.msra.mxu2 %v658_v36  ;;  %515 = vmatpush.bf16.msra.mxu3 %v743_v6  ;;  %v807_v30 = vor.u32 %v869_v28, %v806_v27  ;;  %v811_v32 = vor.u32 %v868_v29, %v808_v31  ;;  %v726_v33 = vld [vmem:[#allocation4 + $0x40] sm:$0xf]  ;;  %v848_v35 = vld [vmem:[#allocation4 + $0x44] sm:$0xf]  ;;  %v728_v37 = vld [vmem:[#allocation4 + $0x48] sm:$0xf0] }
  0x21   :  { %271 = vperm.xlu0 %878, %v75_v16   ;;  %294 = vperm.xlu1 %879, %v75_v16   ;;  %v727_v36 = vor.u32 %v849_v34, %v726_v33  ;;  %v731_v38 = vor.u32 %v848_v35, %v728_v37  ;;  %v798_v39 = vld [vmem:[#allocation4 + $0xd0] sm:$0xf]  ;;  %v866_v41 = vld [vmem:[#allocation4 + $0xd4] sm:$0xf]  ;;  %v800_v43 = vld [vmem:[#allocation4 + $0xd8] sm:$0xf0] }
  0x22   :  { %529 = vmatpush.bf16.msrb.mxu0 %v807_v30  ;;  %v803_v44 = vor.u32 %v866_v41, %v800_v43  ;;  %v718_v45 = vld [vmem:[#allocation4 + $0x30] sm:$0xf]  ;;  %v846_v47 = vld [vmem:[#allocation4 + $0x34] sm:$0xf]  ;;  %v720_v49 = vld [vmem:[#allocation4 + $0x38] sm:$0xf0] }
  0x23   :  { %240 = vmatpush.bf16.msra.mxu1 %v646_v40  ;;  %v867_v40 = vld [vmem:[#allocation4 + $0xd4] sm:$0xf0]  ;;  %v723_v50 = vor.u32 %v846_v47, %v720_v49  ;;  %v790_v51 = vld [vmem:[#allocation4 + $0xc0] sm:$0xf]  ;;  %v864_v53 = vld [vmem:[#allocation4 + $0xc4] sm:$0xf] }
  0x24   :  { %254 = vmatpush.bf16.msra.mxu2 %v650_v42  ;;  %516 = vmatpush.bf16.msra.mxu3 %v735_v17  ;;  %v799_v42 = vor.u32 %v867_v40, %v798_v39  ;;  %v792_v55 = vld [vmem:[#allocation4 + $0xc8] sm:$0xf0]  ;;  %v710_v57 = vld [vmem:[#allocation4 + $0x20] sm:$0xf]  ;;  %v844_v60 = vld [vmem:[#allocation4 + $0x24] sm:$0xf] }
  0x25   :  { %v795_v56 = vor.u32 %v864_v53, %v792_v55  ;;  %v712_v61 = vld [vmem:[#allocation4 + $0x28] sm:$0xf0]  ;;  %v863_v0 = vld [vmem:[#allocation4 + $0xb4] sm:$0xf0]  ;;  %v862_v1 = vld [vmem:[#allocation4 + $0xb4] sm:$0xf] }
  0x26   :  { %530 = vmatpush.bf16.msrb.mxu0 %v799_v42  ;;  %v715_v62 = vor.u32 %v844_v60, %v712_v61  ;;  %v784_v3 = vld [vmem:[#allocation4 + $0xb8] sm:$0xf0]  ;;  %v702_v5 = vld [vmem:[#allocation4 + $0x10] sm:$0xf]  ;;  %v843_v6 = vld [vmem:[#allocation4 + $0x14] sm:$0xf0] }
  0x27   :  { %241 = vmatpush.bf16.msra.mxu1 %v638_v46  ;;  %v847_v46 = vld [vmem:[#allocation4 + $0x34] sm:$0xf0]  ;;  %v787_v4 = vor.u32 %v862_v1, %v784_v3  ;;  %v703_v8 = vor.u32 %v843_v6, %v702_v5  ;;  %v704_v9 = vld [vmem:[#allocation4 + $0x18] sm:$0xf0]  ;;  %v774_v11 = vld [vmem:[#allocation4 + $0xa0] sm:$0xf] }
  0x28   :  { %255 = vmatpush.bf16.msra.mxu2 %v642_v48  ;;  %517 = vmatpush.bf16.msra.mxu3 %v727_v36  ;;  %v719_v48 = vor.u32 %v847_v46, %v718_v45  ;;  %v860_v13 = vld [vmem:[#allocation4 + $0xa4] sm:$0xf]  ;;  %v776_v15 = vld [vmem:[#allocation4 + $0xa8] sm:$0xf0]  ;;  %v694_v17 = vld [vmem:[#allocation4] sm:$0xf] }
  0x29   :  { %880 = vset.pattern.permute.xlu0 %v940_v58  ;;  %v845_v58 = vld [vmem:[#allocation4 + $0x24] sm:$0xf0]  ;;  %v779_v16 = vor.u32 %v860_v13, %v776_v15  ;;  %v768_v27 = vld [vmem:[#allocation4 + $0x98] sm:$0xf0]  ;;  %v758_v29 = vld [vmem:[#allocation4 + $0x80] sm:$0xf] }
  0x2a   :  { %v711_v59 = vor.u32 %v845_v58, %v710_v57  ;;  %v857_v30 = vld [vmem:[#allocation4 + $0x84] sm:$0xf0]  ;;  %v856_v31 = vld [vmem:[#allocation4 + $0x84] sm:$0xf]  ;;  %v760_v33 = vld [vmem:[#allocation4 + $0x88] sm:$0xf0] }
  0x2b   :  { %242 = vmatpush.bf16.msra.mxu1 %v630_v52  ;;  %v865_v52 = vld [vmem:[#allocation4 + $0xc4] sm:$0xf0]  ;;  %v763_v34 = vor.u32 %v856_v31, %v760_v33  ;;  %v263_v35 = vld [vmem:[%s1063_s5] ss:$2 sm:$0x3] }
  0x2c   :  { %256 = vmatpush.bf16.msra.mxu2 %v634_v54  ;;  %518 = vmatpush.bf16.msra.mxu3 %v719_v48  ;;  %v791_v54 = vor.u32 %v865_v52, %v790_v51  ;;  %v149_v37 = vld [vmem:[%s1064_s6] sm:$0x3]  ;;  %v275_v39 = vperm.slane %v263_v35, 0  ;;  %v276_v49 = vperm.slane %v263_v35, 1 }
  0x2d   :  { %v151_v40 = vperm.slane %v149_v37, 0  ;;  %v691_v41 = vld [vmem:[%s1063_s5 + $0x1] ss:$2 sm:$0x3]  ;;  %v152_v46 = vperm.slane %v149_v37, 1 }
  0x2e   :  { %531 = vmatpush.bf16.msrb.mxu0 %v791_v54  ;;  %v299_v57 = vperm.slane %v691_v41, 1 }
  0x2f   :  { %542 = vmatpush.bf16.msrb.mxu1 %v755_v63  ;;  %v782_v63 = vld [vmem:[#allocation4 + $0xb0] sm:$0xf] }
  0x30   :  { %556 = vmatpush.bf16.msrb.mxu2 %v819_v12  ;;  %519 = vmatpush.bf16.msra.mxu3 %v711_v59  ;;  %v783_v2 = vor.u32 %v863_v0, %v782_v63  ;;  %v861_v12 = vld [vmem:[#allocation4 + $0xa4] sm:$0xf0] }
  0x31   :  { %v775_v14 = vor.u32 %v861_v12, %v774_v11 }
  0x32   :  { %532 = vmatpush.bf16.msrb.mxu0 %v783_v2 }
  0x33   :  { %543 = vmatpush.bf16.msrb.mxu1 %v747_v7  ;;  %v842_v7 = vld [vmem:[#allocation4 + $0x14] sm:$0xf] }
  0x34   :  { %557 = vmatpush.bf16.msrb.mxu2 %v811_v32  ;;  %v707_v10 = vor.u32 %v842_v7, %v704_v9  ;;  %520 = vmatpush.bf16.msra.mxu3 %v703_v8  ;;  %v759_v32 = vor.u32 %v857_v30, %v758_v29 }
  0x36   :  { %533 = vmatpush.bf16.msrb.mxu0 %v775_v14  ;;  %v348_v14 = vld [vmem:[%s1066_s8] sm:$0x3] }
  0x37   :  { %544 = vmatpush.bf16.msrb.mxu1 %v739_v18  ;;  %v841_v18 = vld [vmem:[#allocation4 + $0x4] sm:$0xf0]  ;;  %v350_v15 = vperm.slane %v348_v14, 0 }
  0x38   :  { %558 = vmatpush.bf16.msrb.mxu2 %v803_v44  ;;  %v298_v44 = vperm.slane %v691_v41, 0 }
  0x3b   :  { %545 = vmatpush.bf16.msrb.mxu1 %v731_v38 }
  0x3c   :  { %559 = vmatpush.bf16.msrb.mxu2 %v795_v56 }
  0x3f   :  { %546 = vmatpush.bf16.msrb.mxu1 %v723_v50 }
  0x40   :  { %560 = vmatpush.bf16.msrb.mxu2 %v787_v4 }
  0x43   :  { %547 = vmatpush.bf16.msrb.mxu1 %v715_v62 }
  0x44   :  { %561 = vmatpush.bf16.msrb.mxu2 %v779_v16 }
  0x47   :  { %548 = vmatpush.bf16.msrb.mxu1 %v707_v10 }
  0x8b   :  { %v267_v36 = vpop.permute.xlu0 %266  ;;  %v291_v38 = vpop.permute.xlu1 %290 }
  0x8c   :  { %v279_v43 = vmul.f32 %v275_v39, %v267_v36  ;;  %v302_v50 = vmul.f32 %v298_v44, %v291_v38  ;;  %v280_v58 = vmul.f32 %v276_v49, %v267_v36  ;;  %v303_v0 = vmul.f32 %v299_v57, %v291_v38 }
  0x93   :  { %v272_v47 = vpop.permute.xlu0 %271  ;;  %v295_v52 = vpop.permute.xlu1 %294 }
  0x94   :  { %v281_v54 = vmul.f32 %v275_v39, %v272_v47  ;;  %v304_v59 = vmul.f32 %v298_v44, %v295_v52  ;;  %v282_v2 = vmul.f32 %v276_v49, %v272_v47  ;;  %v305_v6 = vmul.f32 %v299_v57, %v295_v52 }
  0x98   :  { %v125_v19 = vpop.f32.mrf.mxu0 }
  0x99   :  { %v126_v21 = vadd.f32 %v881_v20, %v125_v19  ;;  %v840_v19 = vld [vmem:[#allocation4 + $0x4] sm:$0xf] }
  0x9b   :  { %v130_v24 = vmax.f32 %v126_v21, 0.0  ;;  %v696_v21 = vld [vmem:[#allocation4 + $0x8] sm:$0xf0] }
  0xa0   :  { %v127_v22 = vpop.f32.mrf.mxu0 }
  0xa1   :  { %v128_v23 = vadd.f32 %v881_v20, %v127_v22  ;;  %v695_v20 = vor.u32 %v841_v18, %v694_v17  ;;  %v699_v22 = vor.u32 %v840_v19, %v696_v21  ;;  %v574_v19 = vld [vmem:[%s1067_s9] sm:$0x3] }
  0xa2   :  { %v577_v29 = vperm.slane %v574_v19, 1 }
  0xa3   :  { %v131_v25 = vmax.f32 %v128_v23, 0.0  ;;  %v766_v23 = vld [vmem:[#allocation4 + $0x90] sm:$0xf]  ;;  %521 = vmatpush.bf16.msra.mxu3 %v695_v20  ;;  %549 = vmatpush.bf16.msrb.mxu1 %v699_v22  ;;  %v351_v20 = vperm.slane %v348_v14, 1 }
  0xa5   :  { %v132_v26 = vpack.c.bf16 %v131_v25, %v130_v24  ;;  %v859_v24 = vld [vmem:[#allocation4 + $0x94] sm:$0xf0]  ;;  %v858_v25 = vld [vmem:[#allocation4 + $0x94] sm:$0xf] }
  0xa6   :  { %v771_v28 = vor.u32 %v858_v25, %v768_v27 }
  0xa7   :  { %243 = vmatmul.bf16.vlgmr.msra.gmra.mxu1 %v132_v26  ;;  %257 = vmatmul.bf16.vlgmr.msra.gmra.mxu2 %v132_v26  ;;  %v767_v26 = vor.u32 %v859_v24, %v766_v23  ;;  %v576_v23 = vperm.slane %v574_v19, 0 }
  0xa8   :  { %562 = vmatpush.bf16.msrb.mxu2 %v771_v28 }
  0xa9   :  { %534 = vmatpush.bf16.msrb.mxu0 %v767_v26 }
  0xac   :  { %563 = vmatpush.bf16.msrb.mxu2 %v763_v34 }
  0xad   :  { %535 = vmatpush.bf16.msrb.mxu0 %v759_v32 }
 0x124   :  { %v244_v42 = vpop.f32.mrf.mxu1 }
 0x125   :  { %v245_v45 = vadd.f32 %v244_v42, %v151_v40 }
 0x127   :  { %v283_v51 = vadd.f32 %v279_v43, %v245_v45  ;;  %v882_v45 = vld [vmem:[%s1068_s10] ss:$0 sm:$0xff] }
 0x129   :  { %v306_v61 = vadd.f32 %v302_v50, %v283_v51 }
 0x12a   :  { %v258_v48 = vpop.f32.mrf.mxu2 }
 0x12b   :  { %v259_v55 = vadd.f32 %v258_v48, %v152_v46  ;;  %v310_v4 = vmax.f32 %v306_v61, 0.0 }
 0x12c   :  { %v246_v53 = vpop.f32.mrf.mxu1 }
 0x12d   :  { %v247_v56 = vadd.f32 %v246_v53, %v151_v40  ;;  %v284_v62 = vadd.f32 %v280_v58, %v259_v55 }
 0x12f   :  { %v285_v60 = vadd.f32 %v281_v54, %v247_v56  ;;  %v307_v7 = vadd.f32 %v303_v0, %v284_v62 }
 0x131   :  { %v308_v63 = vadd.f32 %v304_v59, %v285_v60  ;;  %v311_v11 = vmax.f32 %v307_v7, 0.0 }
 0x132   :  { %v260_v1 = vpop.f32.mrf.mxu2 }
 0x133   :  { %v261_v3 = vadd.f32 %v260_v1, %v152_v46  ;;  %v312_v5 = vmax.f32 %v308_v63, 0.0 }
 0x135   :  { %v286_v8 = vadd.f32 %v282_v2, %v261_v3  ;;  %v314_v9 = vpack.c.bf16 %v312_v5, %v310_v4 }
 0x137   :  { %v309_v10 = vadd.f32 %v305_v6, %v286_v8  ;;  %522 = vmatmul.bf16.vlgmr.msra.gmra.mxu3 %v314_v9  ;;  %550 = vmatmul.bf16.vlgmr.msrb.gmra.mxu1 %v314_v9 }
 0x139   :  { %v313_v12 = vmax.f32 %v309_v10, 0.0 }
 0x13b   :  { %v315_v13 = vpack.c.bf16 %v313_v12, %v311_v11 }
 0x13d   :  { %536 = vmatmul.bf16.vlgmr.msrb.gmra.mxu0 %v315_v13  ;;  %564 = vmatmul.bf16.vlgmr.msrb.gmra.mxu2 %v315_v13 }
 0x1b4   :  { %v551_v16 = vpop.f32.mrf.mxu1 }
 0x1b5   :  { %v552_v24 = vadd.f32 %v551_v16, %v351_v20 }
 0x1ba   :  { %v523_v17 = vpop.f32.mrf.mxu3  ;;  %v537_v18 = vpop.f32.mrf.mxu0 }
 0x1bb   :  { %v524_v21 = vadd.f32 %v523_v17, %v350_v15 }
 0x1bc   :  { %v553_v33 = vpop.f32.mrf.mxu1 }
 0x1bd   :  { %v538_v22 = vadd.f32 %v537_v18, %v524_v21  ;;  %v554_v37 = vadd.f32 %v553_v33, %v351_v20 }
 0x1bf   :  { %v570_v25 = vmax.f32 %v538_v22, 0.0 }
 0x1c0   :  { %v565_v26 = vpop.f32.mrf.mxu2 }
 0x1c1   :  { %v566_v27 = vadd.f32 %v565_v26, %v552_v24  ;;  %v580_v28 = vmul.f32 %v576_v23, %v570_v25 }
 0x1c2   :  { %v525_v30 = vpop.f32.mrf.mxu3  ;;  %v539_v34 = vpop.f32.mrf.mxu0 }
 0x1c3   :  { %v571_v31 = vmax.f32 %v566_v27, 0.0  ;;  %v526_v32 = vadd.f32 %v525_v30, %v350_v15  ;;  %584 = vadd.xlane.f32.xlu2 %v580_v28 }
 0x1c5   :  { %v540_v35 = vadd.f32 %v539_v34, %v526_v32  ;;  %v581_v36 = vmul.f32 %v577_v29, %v571_v31 }
 0x1c7   :  { %v572_v38 = vmax.f32 %v540_v35, 0.0  ;;  %588 = vadd.xlane.f32.xlu0 %v581_v36 }
 0x1c8   :  { %v567_v39 = vpop.f32.mrf.mxu2 }
 0x1c9   :  { %v568_v40 = vadd.f32 %v567_v39, %v554_v37  ;;  %v582_v41 = vmul.f32 %v576_v23, %v572_v38 }
 0x1cb   :  { %v573_v42 = vmax.f32 %v568_v40, 0.0  ;;  %586 = vadd.xlane.f32.xlu2 %v582_v41 }
 0x1cd   :  { %v583_v43 = vmul.f32 %v577_v29, %v573_v42 }
 0x1cf   :  { %590 = vadd.xlane.f32.xlu1 %v583_v43 }
 0x236   :  { %v585_v44 = vpop.xlane.xlu2 %584 }
 0x23a   :  { %v589_v46 = vpop.xlane.xlu0 %588 }
 0x23b   :  { %v593_v47 = vsel %vm592_vm1, %v585_v44, %v589_v46 }
 0x23c   :  { %v599_v48 = vadd.f32 %v882_v45, %v593_v47 }
 0x23e   :  { %602 = vst.msk [vmem:[%s1069_s11] sm:$0xff] %vm601_vm2, %v599_v48  ;;  %v587_v49 = vpop.xlane.xlu2 %586 }
 0x242   :  { %v591_v50 = vpop.xlane.xlu1 %590 }
 0x243   :  { %v594_v51 = vsel %vm592_vm1, %v587_v49, %v591_v50 }
 0x244   :  { %v600_v52 = vadd.f32 %v882_v45, %v594_v51 }
 0x246   :  { %603 = vst.msk [vmem:[%s1069_s11 + $0x8] sm:$0xff] %vm601_vm2, %v600_v52 }
 0x247   :  { %608 = vsyncpa [#allocation3], 1 }
 0x248   :  { %609 = vsyncpa [#allocation5], 1 }

</bundles_post_ra>
